<compile_context>
chip_gen: v6e
topology: v6e:2x2x1
jax: 0.10.0
libtpu: 0.0.40
codegen_flags: <defaults>
</compile_context>

<pallas_src>
import jax
import jax.numpy as jnp
from jax.experimental import pallas as pl
from jax.experimental.pallas import tpu as pltpu


def _round_up(x, m):
    return (x + m - 1) // m * m


def _pick_images_per_block(n, hw, c, kpad, feat_itemsize, budget_bytes=4 << 20):
    """Largest divisor B of n whose block (~B*HW*(C+Kpad)) fits the byte budget and
    respects the (8, 128) sublane rule when there is more than one block."""
    divisors = [d for d in range(1, n + 1) if n % d == 0]
    valid = [d for d in divisors
             if d == n or (d % 8 == 0 and (d * hw) % 8 == 0)]

    def block_bytes(d):
        return d * hw * (c * feat_itemsize + kpad * 4) + d * kpad * 4

    fitting = [d for d in valid if block_bytes(d) <= budget_bytes]
    return max(fitting) if fitting else min(valid)


# ---------------------------------------------------------------------------
# Kernels
# ---------------------------------------------------------------------------
def _logits_kernel(feats_ref, w_ref, b_ref, alpha_ref, pool_ref, logits_ref):
    # feats_ref : (B*HW, C)   bf16 channels-last pixels of B images
    # w_ref     : (C, Kpad)   bf16 1x1-conv weight (resident)
    # b_ref     : (1, Kpad)   f32 bias
    # alpha_ref : (1, Kpad)   f32 alpha buffer
    # pool_ref  : (B, B*HW)   f32 per-image mean-pooling matrix (resident)
    # logits_ref: (B, Kpad)   f32 pooled logits (out)
    cam = jnp.dot(feats_ref[...], w_ref[...],
                  preferred_element_type=jnp.float32)            # MXU, (B*HW, Kpad)
    cam = cam + b_ref[...]
    cam = jnp.where(cam > 0, cam * alpha_ref[...], cam)
    logits_ref[...] = jnp.dot(pool_ref[...], cam,
                              preferred_element_type=jnp.float32
                              ).astype(logits_ref.dtype)


def _cam_logits_kernel(feats_ref, w_ref, b_ref, alpha_ref, pool_ref,
                       cam_ref, logits_ref):
    # Same as above, plus cam_ref: (B*HW, Kpad) f32 per-pixel CAM (out).
    cam = jnp.dot(feats_ref[...], w_ref[...],
                  preferred_element_type=jnp.float32)
    cam = cam + b_ref[...]
    cam = jnp.where(cam > 0, cam * alpha_ref[...], cam)
    cam_ref[...] = cam.astype(cam_ref.dtype)
    logits_ref[...] = jnp.dot(pool_ref[...], cam,
                              preferred_element_type=jnp.float32
                              ).astype(logits_ref.dtype)


# ---------------------------------------------------------------------------
# Wrappers
# ---------------------------------------------------------------------------
def _head_pallas(feats2d, w, b, a, pool, *, n, hw, kpad, b_imgs, fw_cam):
    num_blocks = n // b_imgs
    c = feats2d.shape[1]

    in_specs = [
        pl.BlockSpec((b_imgs * hw, c), lambda i: (i, 0)),   # feats block (streamed)
        pl.BlockSpec((c, kpad), lambda i: (0, 0)),          # weight (resident)
        pl.BlockSpec((1, kpad), lambda i: (0, 0)),          # bias
        pl.BlockSpec((1, kpad), lambda i: (0, 0)),          # alpha
        pl.BlockSpec((b_imgs, b_imgs * hw), lambda i: (0, 0)),  # pooling matrix
    ]
    logits_spec = pl.BlockSpec((b_imgs, kpad), lambda i: (i, 0))
    logits_shape = jax.ShapeDtypeStruct((n, kpad), jnp.float32)

    if fw_cam:
        kernel = _cam_logits_kernel
        out_shape = (jax.ShapeDtypeStruct((n * hw, kpad), jnp.float32), logits_shape)
        out_specs = (pl.BlockSpec((b_imgs * hw, kpad), lambda i: (i, 0)), logits_spec)
    else:
        kernel = _logits_kernel
        out_shape = logits_shape
        out_specs = logits_spec

    return pl.pallas_call(
        kernel,
        out_shape=out_shape,
        grid_spec=pltpu.PrefetchScalarGridSpec(
            num_scalar_prefetch=0,
            grid=(num_blocks,),
            in_specs=in_specs,
            out_specs=out_specs,
        ),
        compiler_params=pltpu.CompilerParams(
            dimension_semantics=("parallel",)),
    )(feats2d, w, b, a, pool)


def image_classifier_head_nhwc(feats_nhwc, weight, bias, alpha, fw_cam=False,
                               compute_dtype=jnp.bfloat16):
    """feats_nhwc: [N, H, W, C]; weight: [K, C, 1, 1]; bias: [K]; alpha: [1, K]."""
    N, H, W, C = feats_nhwc.shape
    K = weight.shape[0]
    HW = H * W
    Kpad = _round_up(max(K, 128), 128)                     # lane-dense outputs

    # Parameters: pad class dim to Kpad; weight in bf16, bias/alpha stay f32.
    w = weight.reshape(K, C).T.astype(compute_dtype)       # (C, K)
    w = jnp.pad(w, ((0, 0), (0, Kpad - K)))
    b = jnp.pad(bias.reshape(1, K).astype(jnp.float32), ((0, 0), (0, Kpad - K)))
    a = jnp.pad(alpha.reshape(1, K).astype(jnp.float32), ((0, 0), (0, Kpad - K)))

    feats2d = feats_nhwc.reshape(N * HW, C).astype(compute_dtype)

    B = _pick_images_per_block(N, HW, C, Kpad, jnp.dtype(compute_dtype).itemsize)

    # Per-image mean-pooling matrix: logits[b] = (1/HW) * sum over that image's rows.
    row = jnp.arange(B, dtype=jnp.int32)[:, None]
    col = jnp.arange(B * HW, dtype=jnp.int32)[None, :]
    pool = (col // HW == row).astype(jnp.float32) / float(HW)

    if fw_cam:
        cam2d, logits_p = _head_pallas(feats2d, w, b, a, pool, n=N, hw=HW,
                                       kpad=Kpad, b_imgs=B, fw_cam=True)
        logits = logits_p[:, :K]
        cam_nhwc = cam2d[:, :K].reshape(N, H, W, K)
        return logits, cam_nhwc

    logits_p = _head_pallas(feats2d, w, b, a, pool, n=N, hw=HW,
                            kpad=Kpad, b_imgs=B, fw_cam=False)
    return logits_p[:, :K]


def image_classifier_head(feats_nchw, weight, bias, alpha, fw_cam=False,
                          compute_dtype=jnp.bfloat16):
    """NCHW entry point (matches the PyTorch layout exactly)."""
    # TODO(synk): produce the backbone features channels-last and call
    # image_classifier_head_nhwc directly to avoid this HBM relayout.
    feats_nhwc = jnp.transpose(feats_nchw, (0, 2, 3, 1))
    if fw_cam:
        logits, cam_nhwc = image_classifier_head_nhwc(
            feats_nhwc, weight, bias, alpha, fw_cam=True, compute_dtype=compute_dtype)
        return logits, jnp.transpose(cam_nhwc, (0, 3, 1, 2))
    return image_classifier_head_nhwc(
        feats_nhwc, weight, bias, alpha, fw_cam=False, compute_dtype=compute_dtype)


if __name__ == "__main__":
    # Small synthetic shapes: batch=2, feat_dim=32, spatial 8x8, num_classes=16.
    N, C, H, W, K = 2, 32, 8, 8, 16

    key = jax.random.PRNGKey(0)
    k_feat, k_w, k_b = jax.random.split(key, 3)

    feats = jax.random.normal(k_feat, (N, C, H, W), dtype=jnp.float32)
    bound = 1.0 / (C ** 0.5)
    weight = jax.random.uniform(k_w, (K, C, 1, 1), jnp.float32, -bound, bound)
    bias = jax.random.uniform(k_b, (K,), jnp.float32, -bound, bound)
    alpha = jnp.ones((1, K), dtype=jnp.float32)

    head = jax.jit(image_classifier_head, static_argnames=("fw_cam",))

    logits, cam = head(feats, weight, bias, alpha, fw_cam=True)
    logits_only = head(feats, weight, bias, alpha, fw_cam=False)
    logits = jax.block_until_ready(logits)
    cam = jax.block_until_ready(cam)
    logits_only = jax.block_until_ready(logits_only)

    # References: (a) same bf16 input precision as the kernel (tight check),
    # (b) pure f32 PyTorch math (loose drift check for the bf16 optimization).
    w2d = weight.reshape(K, C)
    f_bf = feats.astype(jnp.bfloat16).astype(jnp.float32)
    w_bf = w2d.astype(jnp.bfloat16).astype(jnp.float32)

    def ref_head(f, w):
        cam_r = jnp.einsum("nchw,kc->nkhw", f, w) + bias.reshape(1, K, 1, 1)
        cam_r = jnp.where(cam_r > 0, cam_r * alpha.reshape(1, K, 1, 1), cam_r)
        return jnp.mean(cam_r, axis=(2, 3)), cam_r

    logits_ref, cam_ref = ref_head(f_bf, w_bf)
    logits_f32, cam_f32 = ref_head(feats, w2d)

    assert logits.shape == (N, K) and cam.shape == (N, K, H, W)
    assert logits_only.shape == (N, K)
    assert jnp.allclose(logits, logits_ref, atol=1e-4, rtol=1e-4)
    assert jnp.allclose(cam, cam_ref, atol=1e-4, rtol=1e-4)
    assert jnp.allclose(logits_only, logits, atol=1e-6, rtol=1e-6)
    assert jnp.allclose(logits, logits_f32, atol=5e-2, rtol=5e-2)
    assert jnp.allclose(cam, cam_f32, atol=5e-2, rtol=5e-2)
    print("KERNEL_OK")
</pallas_src>

<mosaic_0001>
module attributes {stable_mosaic.version = 11 : i64} {
  func.func @_cam_logits_kernel(%arg0: i32, %arg1: memref<128x32xbf16, #tpu.memory_space<vmem>>, %arg2: memref<32x128xbf16, #tpu.memory_space<vmem>>, %arg3: memref<1x128xf32, #tpu.memory_space<vmem>>, %arg4: memref<1x128xf32, #tpu.memory_space<vmem>>, %arg5: memref<2x128xf32, #tpu.memory_space<vmem>>, %arg6: memref<128x128xf32, #tpu.memory_space<vmem>>, %arg7: memref<2x128xf32, #tpu.memory_space<vmem>>) attributes {dimension_semantics = [#tpu.dimension_semantics<parallel>], iteration_bounds = array<i64: 1>, scalar_prefetch = 0 : i64, scratch_operands = 0 : i64, tpu.core_type = #tpu.core_type<tc>, window_params = [{transform_indices = @transform_0, window_bounds = array<i64: 128, 32>}, {pipeline_mode = #tpu.pipeline_mode<synchronous>, transform_indices = @transform_1, window_bounds = array<i64: 32, 128>}, {pipeline_mode = #tpu.pipeline_mode<synchronous>, transform_indices = @transform_2, window_bounds = array<i64: 1, 128>}, {pipeline_mode = #tpu.pipeline_mode<synchronous>, transform_indices = @transform_3, window_bounds = array<i64: 1, 128>}, {pipeline_mode = #tpu.pipeline_mode<synchronous>, transform_indices = @transform_4, window_bounds = array<i64: 2, 128>}, {transform_indices = @transform_5, window_bounds = array<i64: 128, 128>}, {transform_indices = @transform_6, window_bounds = array<i64: 2, 128>}]} {
    %c0 = arith.constant 0 : index
    %c0_0 = arith.constant 0 : index
    %0 = vector.load %arg1[%c0, %c0_0] : memref<128x32xbf16, #tpu.memory_space<vmem>>, vector<128x32xbf16>
    %c0_1 = arith.constant 0 : index
    %c0_2 = arith.constant 0 : index
    %1 = vector.load %arg2[%c0_1, %c0_2] : memref<32x128xbf16, #tpu.memory_space<vmem>>, vector<32x128xbf16>
    %cst = arith.constant dense<0.000000e+00> : vector<128x128xf32>
    %2 = tpu.matmul %0, %1, %cst {dimension_numbers = #tpu.dot_dimension_numbers<[1], [0], [0], [1], [0, 0, 1, 1], [], []>} : vector<128x32xbf16>, vector<32x128xbf16>, vector<128x128xf32> -> vector<128x128xf32>
    %c0_3 = arith.constant 0 : index
    %c0_4 = arith.constant 0 : index
    %3 = vector.load %arg3[%c0_3, %c0_4] : memref<1x128xf32, #tpu.memory_space<vmem>>, vector<1x128xf32>
    %4 = vector.broadcast %3 : vector<1x128xf32> to vector<128x128xf32>
    %5 = arith.addf %2, %4 : vector<128x128xf32>
    %cst_5 = arith.constant 0.000000e+00 : f32
    %6 = vector.broadcast %cst_5 : f32 to vector<128x128xf32>
    %7 = arith.cmpf ogt, %5, %6 : vector<128x128xf32>
    %c0_6 = arith.constant 0 : index
    %c0_7 = arith.constant 0 : index
    %8 = vector.load %arg4[%c0_6, %c0_7] : memref<1x128xf32, #tpu.memory_space<vmem>>, vector<1x128xf32>
    %9 = vector.broadcast %8 : vector<1x128xf32> to vector<128x128xf32>
    %10 = arith.mulf %5, %9 : vector<128x128xf32>
    %11 = arith.select %7, %10, %5 : vector<128x128xi1>, vector<128x128xf32>
    %c0_8 = arith.constant 0 : index
    %c0_9 = arith.constant 0 : index
    %12 = vector.load %arg6[%c0_8, %c0_9] : memref<128x128xf32, #tpu.memory_space<vmem>>, vector<128x128xf32>
    tpu.vector_store %arg6[%c0_8, %c0_9], %11 {strides = array<i32>} : memref<128x128xf32, #tpu.memory_space<vmem>>, vector<128x128xf32>,
    %c0_10 = arith.constant 0 : index
    %c0_11 = arith.constant 0 : index
    %13 = vector.load %arg5[%c0_10, %c0_11] : memref<2x128xf32, #tpu.memory_space<vmem>>, vector<2x128xf32>
    %cst_12 = arith.constant dense<0.000000e+00> : vector<2x128xf32>
    %14 = tpu.matmul %13, %11, %cst_12 {dimension_numbers = #tpu.dot_dimension_numbers<[1], [0], [0], [1], [0, 0, 1, 1], [], []>} : vector<2x128xf32>, vector<128x128xf32>, vector<2x128xf32> -> vector<2x128xf32>
    %c0_13 = arith.constant 0 : index
    %c0_14 = arith.constant 0 : index
    %15 = vector.load %arg7[%c0_13, %c0_14] : memref<2x128xf32, #tpu.memory_space<vmem>>, vector<2x128xf32>
    tpu.vector_store %arg7[%c0_13, %c0_14], %14 {strides = array<i32>} : memref<2x128xf32, #tpu.memory_space<vmem>>, vector<2x128xf32>,
    return
  }
  func.func @transform_0(%arg0: i32) -> (i32, i32) {
    %c0_i32 = arith.constant 0 : i32
    %c0_i32_0 = arith.constant 0 : i32
    return %arg0, %c0_i32 : i32, i32
  }
  func.func @transform_1(%arg0: i32) -> (i32, i32) {
    %c0_i32 = arith.constant 0 : i32
    %c0_i32_0 = arith.constant 0 : i32
    %c0_i32_1 = arith.constant 0 : i32
    return %c0_i32, %c0_i32_0 : i32, i32
  }
  func.func @transform_2(%arg0: i32) -> (i32, i32) {
    %c0_i32 = arith.constant 0 : i32
    %c0_i32_0 = arith.constant 0 : i32
    %c0_i32_1 = arith.constant 0 : i32
    return %c0_i32, %c0_i32_0 : i32, i32
  }
  func.func @transform_3(%arg0: i32) -> (i32, i32) {
    %c0_i32 = arith.constant 0 : i32
    %c0_i32_0 = arith.constant 0 : i32
    %c0_i32_1 = arith.constant 0 : i32
    return %c0_i32, %c0_i32_0 : i32, i32
  }
  func.func @transform_4(%arg0: i32) -> (i32, i32) {
    %c0_i32 = arith.constant 0 : i32
    %c0_i32_0 = arith.constant 0 : i32
    %c0_i32_1 = arith.constant 0 : i32
    return %c0_i32, %c0_i32_0 : i32, i32
  }
  func.func @transform_5(%arg0: i32) -> (i32, i32) {
    %c0_i32 = arith.constant 0 : i32
    %c0_i32_0 = arith.constant 0 : i32
    return %arg0, %c0_i32 : i32, i32
  }
  func.func @transform_6(%arg0: i32) -> (i32, i32) {
    %c0_i32 = arith.constant 0 : i32
    %c0_i32_0 = arith.constant 0 : i32
    return %arg0, %c0_i32 : i32, i32
  }
}

</mosaic_0001>

<bundles_post_ra>
// kernel: image_classifier_head.1
= control target key start
LH: loop header
LB: loop body
LE: loop exit
PB: predicated region body
PF: predicated region fallthrough
CT: control target
= control target key end

     0   :  { %12 = vsyncpa [#allocation3], 0  ;;  %vm104_vm0 = vcmask 261120   ;;  %s740_s0 = inlined_call_operand.vmem [shape: bf16[128,32], index: 0, kind: input, shape index: {}]   ;;  %s741_s1 = inlined_call_operand.vmem [shape: bf16[32,128], index: 1, kind: input, shape index: {}]   ;;  %s742_s2 = inlined_call_operand.vmem [shape: f32[1,128], index: 2, kind: input, shape index: {}]   ;;  %s743_s3 = inlined_call_operand.vmem [shape: f32[1,128], index: 3, kind: input, shape index: {}]   ;;  %s744_s4 = inlined_call_operand.vmem [shape: f32[2,128], index: 4, kind: input, shape index: {}]   ;;  %s745_s5 = inlined_call_operand.hbm [shape: f32[128,128], index: 5, kind: output, shape index: {0}]   ;;  %s746_s6 = inlined_call_operand.hbm [shape: f32[2,128], index: 6, kind: output, shape index: {1}]  }
   0x1   :  { %v507_v0 = vld [vmem:[%s741_s1 + $0x8] sm:$0xff]   ;;  %v508_v1 = vld [vmem:[%s741_s1] sm:$0xff]   ;;  %v511_v4 = vld [vmem:[%s740_s0 + $0x10] sm:$0xff]  }
   0x2   :  { %446 = vmatprep.subr.bf16.mxu0 %v507_v0  ;;  %v509_v2 = vld [vmem:[%s740_s0] sm:$0xff]   ;;  %v510_v3 = vld [vmem:[%s740_s0 + $0x8] sm:$0xff]  }
   0x3   :  { %447 = vmatpush3.bf16.msra.mxu0 %v507_v0  ;;  %450 = vmatprep.mubr.msk.bf16.mxu0 %vm104_vm0, %v509_v2 }
   0x4   :  { %448 = vmatprep.subr.bf16.mxu0 %v508_v1 }
   0x7   :  { %449 = vmatpush3.bf16.msra.mxu0 %v508_v1 }
   0xa   :  { %451 = vmatmul.mubr.msk.bf16.vlgmr.msra.gmra.mxu0 %vm104_vm0, %v510_v3 }
   0xb   :  { %13 = vsyncpa [#allocation5], 0  ;;  %454 = vmatprep.mubr.msk.bf16.mxu0 %vm104_vm0, %v511_v4  ;;  %v512_v5 = vld [vmem:[%s740_s0 + $0x18] sm:$0xff]   ;;  %v513_v6 = vld [vmem:[%s740_s0 + $0x20] sm:$0xff]   ;;  %v561_v10 = vmov 0.0   ;;  %vm562_vm1 = vmmov 0  }
   0xc   :  { %v514_v7 = vld [vmem:[%s740_s0 + $0x28] sm:$0xff]   ;;  %v515_v8 = vld [vmem:[%s740_s0 + $0x30] sm:$0xff]   ;;  %v516_v9 = vld [vmem:[%s740_s0 + $0x38] sm:$0xff]   ;;  %466 = vmatprep.subr.mxu1 %v561_v10  ;;  %498 = vmatprep.mubr.msk.f32.mxu1 %vm562_vm1, %v561_v10 }
   0xd   :  { %v645_v11 = vld [vmem:[%s742_s2] ss:$0 sm:$0xff] }
   0xe   :  { %v650_v13 = vld [vmem:[%s743_s3] ss:$0 sm:$0xff]  ;;  %s563_s3 = smov [#allocation2]  }
   0xf   :  { %s374_s20 = sshll.u32 %s563_s3, 4  ;;  %s375_s20 = int_to_ptr.vmem [resolvable:$true] %s374_s20 }
  0x10   :  { %s517_s21 = scalar_lea.vmem %s375_s20, 2048  ;;  %p522_p1 = scmp.lt.s32.totalorder %s375_s20, %s375_s20 }
  0x11   :  { %p518_p0 = scmp.ne.s32.totalorder %s375_s20, %s517_s21  ;;  %p523_p2 = scmp.lt.s32.totalorder %s517_s21, %s517_s21 }
  0x12   :  { %455 = vmatmul.mubr.msk.bf16.gmra.mxu0 %vm104_vm0, %v512_v5 }
  0x13   :  { %458 = vmatprep.mubr.msk.bf16.mxu0 %vm104_vm0, %v513_v6  ;;  %p524_p3 = por %p523_p2, %p522_p1 }
  0x15   :  { %p525_p4 = pnand %p524_p3, %p518_p0 }
  0x1a   :  { %459 = vmatmul.mubr.msk.bf16.gmra.mxu0 %vm104_vm0, %v514_v7 }
  0x1b   :  { %462 = vmatprep.mubr.msk.bf16.mxu0 %vm104_vm0, %v515_v8 }
  0x22   :  { %463 = vmatmul.mubr.msk.bf16.gmra.mxu0 %vm104_vm0, %v516_v9 }
  0xca   :  { %v452_v12 = vpop.f32.mrf.mxu0 }
  0xcb   :  { %v172_v14 = vadd.f32 %v452_v12, %v645_v11 }
  0xcc   :  { %v163_v15 = vpop.f32.mrf.mxu0 }
  0xcd   :  { %v251_v16 = vmul.f32 %v650_v13, %v172_v14  ;;  %v164_v17 = vadd.f32 %v645_v11, %v163_v15  ;;  %vm228_vm2 = vcmp.gt.f32.partialorder %v172_v14, 0.0 }
  0xce   :  { %v453_v18 = vpop.f32.mrf.mxu0 }
  0xcf   :  { %v249_v19 = vmul.f32 %v650_v13, %v164_v17  ;;  %v175_v20 = vadd.f32 %v453_v18, %v645_v11  ;;  %v657_v21 = vsel %vm228_vm2, %v251_v16, %v172_v14  ;;  %vm226_vm3 = vcmp.gt.f32.partialorder %v164_v17, 0.0 }
  0xd0   :  { %v166_v22 = vpop.f32.mrf.mxu0  ;;  %283 = vst [vmem:[#allocation2 + $0x10] sm:$0xff] %v657_v21 }
  0xd1   :  { %v252_v23 = vmul.f32 %v650_v13, %v175_v20  ;;  %v167_v24 = vadd.f32 %v645_v11, %v166_v22  ;;  %vm229_vm4 = vcmp.gt.f32.partialorder %v175_v20, 0.0  ;;  %v662_v25 = vsel %vm226_vm3, %v249_v19, %v164_v17 }
  0xd2   :  { %v456_v26 = vpop.f32.mrf.mxu0  ;;  %281 = vst [vmem:[#allocation2] sm:$0xff] %v662_v25 }
  0xd3   :  { %v250_v27 = vmul.f32 %v650_v13, %v167_v24  ;;  %v188_v28 = vadd.f32 %v456_v26, %v645_v11  ;;  %v667_v29 = vsel %vm229_vm4, %v252_v23, %v175_v20  ;;  %vm227_vm5 = vcmp.gt.f32.partialorder %v167_v24, 0.0 }
  0xd4   :  { %v179_v30 = vpop.f32.mrf.mxu0  ;;  %284 = vst [vmem:[#allocation2 + $0x18] sm:$0xff] %v667_v29 }
  0xd5   :  { %v255_v31 = vmul.f32 %v650_v13, %v188_v28  ;;  %v180_v32 = vadd.f32 %v645_v11, %v179_v30  ;;  %vm232_vm6 = vcmp.gt.f32.partialorder %v188_v28, 0.0  ;;  %v672_v33 = vsel %vm227_vm5, %v250_v27, %v167_v24 }
  0xd6   :  { %v457_v34 = vpop.f32.mrf.mxu0  ;;  %282 = vst [vmem:[#allocation2 + $0x8] sm:$0xff] %v672_v33 }
  0xd7   :  { %v253_v35 = vmul.f32 %v650_v13, %v180_v32  ;;  %v191_v36 = vadd.f32 %v457_v34, %v645_v11  ;;  %v677_v37 = vsel %vm232_vm6, %v255_v31, %v188_v28  ;;  %vm230_vm7 = vcmp.gt.f32.partialorder %v180_v32, 0.0 }
  0xd8   :  { %v182_v38 = vpop.f32.mrf.mxu0  ;;  %287 = vst [vmem:[#allocation2 + $0x30] sm:$0xff] %v677_v37 }
  0xd9   :  { %v256_v39 = vmul.f32 %v650_v13, %v191_v36  ;;  %v183_v40 = vadd.f32 %v645_v11, %v182_v38  ;;  %vm233_vm8 = vcmp.gt.f32.partialorder %v191_v36, 0.0  ;;  %v682_v41 = vsel %vm230_vm7, %v253_v35, %v180_v32 }
  0xda   :  { %v460_v42 = vpop.f32.mrf.mxu0  ;;  %285 = vst [vmem:[#allocation2 + $0x20] sm:$0xff] %v682_v41 }
  0xdb   :  { %v254_v43 = vmul.f32 %v650_v13, %v183_v40  ;;  %v204_v44 = vadd.f32 %v460_v42, %v645_v11  ;;  %v687_v45 = vsel %vm233_vm8, %v256_v39, %v191_v36  ;;  %vm231_vm9 = vcmp.gt.f32.partialorder %v183_v40, 0.0 }
  0xdc   :  { %v195_v46 = vpop.f32.mrf.mxu0  ;;  %288 = vst [vmem:[#allocation2 + $0x38] sm:$0xff] %v687_v45 }
  0xdd   :  { %v259_v47 = vmul.f32 %v650_v13, %v204_v44  ;;  %v196_v48 = vadd.f32 %v645_v11, %v195_v46  ;;  %vm236_vm10 = vcmp.gt.f32.partialorder %v204_v44, 0.0  ;;  %v692_v49 = vsel %vm231_vm9, %v254_v43, %v183_v40 }
  0xde   :  { %v461_v50 = vpop.f32.mrf.mxu0  ;;  %286 = vst [vmem:[#allocation2 + $0x28] sm:$0xff] %v692_v49 }
  0xdf   :  { %v257_v51 = vmul.f32 %v650_v13, %v196_v48  ;;  %v207_v52 = vadd.f32 %v461_v50, %v645_v11  ;;  %v275_v53 = vsel %vm236_vm10, %v259_v47, %v204_v44  ;;  %vm234_vm11 = vcmp.gt.f32.partialorder %v196_v48, 0.0 }
  0xe0   :  { %v198_v54 = vpop.f32.mrf.mxu0  ;;  %291 = vst [vmem:[#allocation2 + $0x50] sm:$0xff] %v275_v53 }
  0xe1   :  { %v260_v55 = vmul.f32 %v650_v13, %v207_v52  ;;  %v199_v56 = vadd.f32 %v645_v11, %v198_v54  ;;  %vm237_vm12 = vcmp.gt.f32.partialorder %v207_v52, 0.0  ;;  %v273_v57 = vsel %vm234_vm11, %v257_v51, %v196_v48 }
  0xe2   :  { %v464_v58 = vpop.f32.mrf.mxu0  ;;  %289 = vst [vmem:[#allocation2 + $0x40] sm:$0xff] %v273_v57 }
  0xe3   :  { %v258_v59 = vmul.f32 %v650_v13, %v199_v56  ;;  %v220_v60 = vadd.f32 %v464_v58, %v645_v11  ;;  %v276_v61 = vsel %vm237_vm12, %v260_v55, %v207_v52  ;;  %vm235_vm13 = vcmp.gt.f32.partialorder %v199_v56, 0.0 }
  0xe4   :  { %v211_v62 = vpop.f32.mrf.mxu0  ;;  %292 = vst [vmem:[#allocation2 + $0x58] sm:$0xff] %v276_v61 }
  0xe5   :  { %v263_v63 = vmul.f32 %v650_v13, %v220_v60  ;;  %v212_v0 = vadd.f32 %v645_v11, %v211_v62  ;;  %vm240_vm14 = vcmp.gt.f32.partialorder %v220_v60, 0.0  ;;  %v274_v1 = vsel %vm235_vm13, %v258_v59, %v199_v56 }
  0xe6   :  { %v465_v2 = vpop.f32.mrf.mxu0  ;;  %290 = vst [vmem:[#allocation2 + $0x48] sm:$0xff] %v274_v1 }
  0xe7   :  { %v261_v3 = vmul.f32 %v650_v13, %v212_v0  ;;  %v223_v4 = vadd.f32 %v465_v2, %v645_v11  ;;  %v279_v5 = vsel %vm240_vm14, %v263_v63, %v220_v60  ;;  %vm238_vm15 = vcmp.gt.f32.partialorder %v212_v0, 0.0 }
  0xe8   :  { %v214_v6 = vpop.f32.mrf.mxu0  ;;  %295 = vst [vmem:[#allocation2 + $0x70] sm:$0xff] %v279_v5 }
  0xe9   :  { %v215_v7 = vadd.f32 %v645_v11, %v214_v6  ;;  %vm241_vm0 = vcmp.gt.f32.partialorder %v223_v4, 0.0  ;;  %v264_v8 = vmul.f32 %v650_v13, %v223_v4  ;;  %v277_v9 = vsel %vm238_vm15, %v261_v3, %v212_v0  ;;  %v297_v11 = vld [vmem:[%s744_s4] sm:$0x3] }
  0xea   :  { %293 = vst [vmem:[#allocation2 + $0x60] sm:$0xff] %v277_v9 }
  0xeb   :  { %v262_v12 = vmul.f32 %v650_v13, %v215_v7  ;;  %v280_v14 = vsel %vm241_vm0, %v264_v8, %v223_v4  ;;  %vm239_vm1 = vcmp.gt.f32.partialorder %v215_v7, 0.0 }
  0xec   :  { %296 = vst [vmem:[#allocation2 + $0x78] sm:$0xff] %v280_v14  ;;  %467 = vmatpush3.msra.mxu1 %v280_v14 }
  0xed   :  { %468 = vmatprep.subr.mxu1 %v561_v10  ;;  %v278_v15 = vsel %vm239_vm1, %v262_v12, %v215_v7 }
  0xee   :  { %469 = vmatpush3.msra.mxu1 %v279_v5  ;;  %294 = vst [vmem:[#allocation2 + $0x68] sm:$0xff] %v278_v15 }
  0xef   :  { %470 = vmatprep.subr.mxu1 %v561_v10 }
  0xf0   :  { %471 = vmatpush3.msra.mxu1 %v278_v15 }
  0xf1   :  { %472 = vmatprep.subr.mxu1 %v561_v10 }
  0xf2   :  { %473 = vmatpush3.msra.mxu1 %v277_v9 }
  0xf3   :  { %474 = vmatprep.subr.mxu1 %v561_v10 }
  0xf4   :  { %475 = vmatpush3.msra.mxu1 %v276_v61 }
  0xf5   :  { %476 = vmatprep.subr.mxu1 %v561_v10 }
  0xf6   :  { %477 = vmatpush3.msra.mxu1 %v275_v53 }
  0xf7   :  { %478 = vmatprep.subr.mxu1 %v561_v10 }
  0xf8   :  { %479 = vmatpush3.msra.mxu1 %v274_v1 }
  0xf9   :  { %480 = vmatprep.subr.mxu1 %v561_v10 }
  0xfa   :  { %481 = vmatpush3.msra.mxu1 %v273_v57 }
  0xfb   :  { %482 = vmatprep.subr.mxu1 %v561_v10 }
  0xfc   :  { %483 = vmatpush3.msra.mxu1 %v687_v45 }
  0xfd   :  { %484 = vmatprep.subr.mxu1 %v561_v10 }
  0xfe   :  { %485 = vmatpush3.msra.mxu1 %v677_v37 }
  0xff   :  { %486 = vmatprep.subr.mxu1 %v561_v10 }
 0x100   :  { %487 = vmatpush3.msra.mxu1 %v692_v49 }
 0x101   :  { %488 = vmatprep.subr.mxu1 %v561_v10 }
 0x102   :  { %489 = vmatpush3.msra.mxu1 %v682_v41 }
 0x103   :  { %490 = vmatprep.subr.mxu1 %v561_v10 }
 0x104   :  { %491 = vmatpush3.msra.mxu1 %v667_v29 }
 0x105   :  { %492 = vmatprep.subr.mxu1 %v561_v10 }
 0x106   :  { %493 = vmatpush3.msra.mxu1 %v657_v21 }
 0x107   :  { %494 = vmatprep.subr.mxu1 %v561_v10 }
 0x108   :  { %495 = vmatpush3.msra.mxu1 %v672_v33 }
 0x109   :  { %496 = vmatprep.subr.mxu1 %v561_v10 }
 0x10a   :  { %497 = vmatpush3.msra.mxu1 %v662_v25 }
 0x10b   :  { %499 = vmatmul.mubr.f32.vlgmr.msra.gmra.mxu1 %v297_v11 }
 0x10c   :  { %528 = shalt.err (!%p525_p4)
}
 0x10d   :  { %s564_s22 = smov 128   ;;  %s565_s23 = smov 8  }
 0x10e   :  { %380 = dma.vmem_to_hbm [thread:$0]  %s375_s20, 2048, %s745_s5, [#allocation3], %s564_s22, %s564_s22, %s565_s23  }
 0x10f   :  { %s566_s4 = smov [#allocation4]  }
 0x110   :  { %s387_s26 = sshll.u32 %s566_s4, 4  ;;  %s388_s26 = int_to_ptr.vmem [resolvable:$true] %s387_s26 }
 0x111   :  { %s537_s27 = scalar_lea.vmem %s388_s26, 32  ;;  %p542_p6 = scmp.lt.s32.totalorder %s388_s26, %s388_s26 }
 0x112   :  { %p538_p5 = scmp.ne.s32.totalorder %s388_s26, %s537_s27  ;;  %p543_p7 = scmp.lt.s32.totalorder %s537_s27, %s537_s27 }
 0x114   :  { %p544_p8 = por %p543_p7, %p542_p6 }
 0x116   :  { %p545_p9 = pnand %p544_p8, %p538_p5 }
 0x1cb   :  { %v364_v10 = vpop.f32.mrf.mxu1 }
 0x1cc   :  { %368 = vst [vmem:[#allocation4] sm:$0x3] %v364_v10 }
 0x1cd   :  { %v500_v13 = vpop.f32.mrf.mxu1 }
 0x1ce   :  { %548 = shalt.err (!%p545_p9)
}
 0x1cf   :  { %390 = dma.vmem_to_hbm [thread:$0]  %s388_s26, 32, %s746_s6, [#allocation5]  }
 0x1d0   :  { %557 = dma.done.wait [#allocation3], 2048  }
 0x1d1   :  { %558 = vsyncadd [#allocation3], 4294965248 }
 0x1d2   :  { %559 = dma.done.wait [#allocation5], 32  }
 0x1d3   :  { %560 = vsyncadd [#allocation5], 4294967264 }
 0x1d4   :  { %397 = vsyncpa [#allocation3], 1 }
 0x1d5   :  { %398 = vsyncpa [#allocation5], 1 }

</bundles_post_ra>
